<compile_context>
chip_gen: v5e
topology: v5e:2x2
jax: 0.10.0
libtpu: 0.0.40
codegen_flags: <defaults>
</compile_context>

<pallas_src>
import functools

import jax
import jax.numpy as jnp
import numpy as np
from jax import lax
from jax.experimental import pallas as pl
from jax.experimental.pallas import tpu as pltpu


def _round_up(x, m):
    return (x + m - 1) // m * m


def _same_pad_masks(H, W):
    """(9, H*W) f32 masks: masks[tap, h*W + w] = 1 iff (h+dy, w+dx) in-bounds."""
    hh, ww = np.meshgrid(np.arange(H), np.arange(W), indexing="ij")
    masks = np.zeros((9, H * W), np.float32)
    for tap in range(9):
        dy, dx = tap // 3 - 1, tap % 3 - 1
        valid = (hh + dy >= 0) & (hh + dy < H) & (ww + dx >= 0) & (ww + dx < W)
        masks[tap] = valid.reshape(-1).astype(np.float32)
    return masks


def _vmem_budget_bytes():
    """~3/4 of this generation's physical VMEM (v7x 64MiB -> ~48MiB,
    v5e/v6e 128MiB -> ~96MiB). Falls back to 48MiB if the query fails."""
    try:
        cap = int(pltpu.get_tpu_info().vmem_capacity_bytes)
    except Exception:
        cap = 64 * 1024 * 1024
    return (cap * 3) // 4


def _choose_images_per_step(N, per_image_io_bytes, fixed_bytes, budget):
    """Largest divisor of N whose double-buffered I/O blocks fit the VMEM
    budget, while keeping >=2 grid steps (v7x has 2 TensorCores)."""
    io_budget = max(0, budget - fixed_bytes)
    max_nb = max(1, io_budget // max(1, 2 * per_image_io_bytes))
    best = 1
    for nb in range(1, N + 1):
        if N % nb:
            continue
        if nb > max_nb:
            continue
        if N >= 2 and (N // nb) < 2:
            continue
        best = nb
    return best


def _fill_patches(patch_scr, src, m_ref, cgrp, H, W):
    """patch rows [tap*cgrp:(tap+1)*cgrp] <- mask_tap * shift_tap(src).

    src: (cgrp, H*W) value, already in the patch (matmul) dtype.
    m_ref: (9, cbig, H*W) masks, pre-broadcast along sublanes (cbig >= cgrp)."""
    P = H * W
    for tap in range(9):
        dy, dx = tap // 3 - 1, tap % 3 - 1
        # out[p] = src[p + dy*W + dx]  ==  roll(src, -(dy*W+dx))[p]
        shift = (-(dy * W + dx)) % P
        shifted = src if shift == 0 else pltpu.roll(src, shift, axis=1)
        if tap == 4:
            vals = shifted                       # center tap: mask is all-ones
        else:
            m = m_ref[tap]                       # (cbig, P): plain aligned load
            if m.shape[0] != cgrp:
                m = m[0:cgrp, :]
            vals = shifted * m
        if vals.dtype != patch_scr.dtype:
            vals = vals.astype(patch_scr.dtype)
        patch_scr[tap * cgrp:(tap + 1) * cgrp, :] = vals


def _resblock_kernel(x_ref, d_ref, w1_ref, b1_ref, w2_ref, b2_ref, m_ref,
                     out_ref, xcat_scr, patch_scr, *, H, W, res_scale, nb):
    # x_ref    : (nb, Cx,   H*W)   residual / conv input (flat NCHW)
    # d_ref    : (nb, 1,    H*W)   disparity channel
    # w1_ref   : (Cmid_p, 9*Cin_p) conv1 weights (tap-major, channel-padded)
    # b1_ref   : (Cmid_p, 1)
    # w2_ref   : (Cout,  9*Cmid_p) conv2 weights
    # b2_ref   : (Cout, 1)
    # m_ref    : (9, cbig, H*W)    SAME-padding masks, sublane-pre-broadcast
    # out_ref  : (nb, Cout, H*W)
    # xcat_scr : (Cin_p, H*W)      concat([disp, x]) staging (matmul dtype)
    # patch_scr: (9*max(Cin_p,Cmid_p), H*W)  im2col scratch SHARED by both convs
    P = H * W
    cx = x_ref.shape[1]
    cin = cx + 1
    cin_p = xcat_scr.shape[0]
    cmid_p = w1_ref.shape[0]
    mat_dtype = patch_scr.dtype

    # Zero the pad channels of the staging buffer once per grid step (they are
    # never overwritten inside the per-image loop).  NOTE: do NOT gate this
    # with pl.when(program_id==0) — unsafe under "parallel" semantics.
    if cin_p > cin:
        xcat_scr[cin:, :] = jnp.zeros((cin_p - cin, P), mat_dtype)

    # Per-image loop (rolls must not wrap across image boundaries, so images
    # are kept separate along the block's leading axis, not folded into lanes).
    for img in range(nb):
        # ---- fused concat([disp, x], C) (+ zero channel pad), in VMEM ----
        xcat_scr[0:1, :] = d_ref[img].astype(mat_dtype)
        xcat_scr[1:cin, :] = x_ref[img].astype(mat_dtype)
        xcat = xcat_scr[...]                       # (Cin_p, P), matmul dtype

        # ---- conv1: one K = 9*Cin_p matmul + bias + ReLU ----
        _fill_patches(patch_scr, xcat, m_ref, cin_p, H, W)
        hidden = jnp.dot(w1_ref[...], patch_scr[0:9 * cin_p, :],
                         preferred_element_type=jnp.float32)
        hidden = jnp.maximum(hidden + b1_ref[...], 0.0)   # (Cmid_p, P), f32

        # ---- conv2: one K = 9*Cmid_p matmul + bias (shared patch scratch) ----
        _fill_patches(patch_scr, hidden.astype(mat_dtype), m_ref, cmid_p, H, W)
        y = jnp.dot(w2_ref[...], patch_scr[0:9 * cmid_p, :],
                    preferred_element_type=jnp.float32)
        y = y + b2_ref[...]                               # (Cout, P), f32

        # ---- residual; lane-dense store, already flat NCHW ----
        out_ref[img] = (x_ref[img].astype(jnp.float32)
                        + y * res_scale).astype(out_ref.dtype)


def resblock_forward(x_nchw, disp_nchw, w1, b1, w2, b2, res_scale=1.0,
                     matmul_dtype=jnp.float32):
    """x_nchw: (N, n_feats, H, W), disp_nchw: (N, 1, H, W).
    w1: (3,3,n_feats+1,Cmid) HWIO, b1: (Cmid,), w2: (3,3,Cmid,n_feats), b2: (n_feats,).
    matmul_dtype=jnp.bfloat16 carries patches/masks/xcat in bf16 (v6e/v7x),
    f32 accumulation."""
    N, cx, H, W = x_nchw.shape
    P = H * W
    cin = cx + 1
    cmid = w1.shape[-1]
    cout = w2.shape[-1]
    assert w1.shape == (3, 3, cin, cmid) and w2.shape == (3, 3, cmid, cout)
    assert cout == cx and disp_nchw.shape == (N, 1, H, W)

    cin_p = _round_up(cin, 8)
    cmid_p = _round_up(cmid, 8)
    cbig = max(cin_p, cmid_p)

    # Conv weights -> (C_out, 9*C_in_padded), tap-major / channel-minor columns.
    w1p = jnp.pad(w1, ((0, 0), (0, 0), (0, cin_p - cin), (0, cmid_p - cmid)))
    w1mat = w1p.reshape(9 * cin_p, cmid_p).T.astype(matmul_dtype)   # (Cmid_p, 9*Cin_p)
    b1v = jnp.pad(b1, (0, cmid_p - cmid)).reshape(cmid_p, 1).astype(jnp.float32)
    w2p = jnp.pad(w2, ((0, 0), (0, 0), (0, cmid_p - cmid), (0, 0)))
    w2mat = w2p.reshape(9 * cmid_p, cout).T.astype(matmul_dtype)    # (Cout, 9*Cmid_p)
    b2v = b2.reshape(cout, 1).astype(jnp.float32)

    # SAME-pad masks, pre-broadcast along sublanes so the kernel does plain
    # aligned loads (no per-tap XLU sublane broadcast), in the matmul dtype.
    masks_np = _same_pad_masks(H, W)                                # (9, P)
    masks = jnp.broadcast_to(
        jnp.asarray(masks_np, dtype=matmul_dtype)[:, None, :], (9, cbig, P))

    # Flat-NCHW views -- pure reshapes, no transpose / concat / pad in HBM.
    x_flat = x_nchw.reshape(N, cx, P)
    d_flat = disp_nchw.reshape(N, 1, P)

    # Generation-aware VMEM budget and images-per-step choice.
    in_itemsize = np.dtype(x_nchw.dtype).itemsize
    mat_itemsize = np.dtype(matmul_dtype).itemsize
    per_image_io = (cx + 1 + cout) * P * in_itemsize
    fixed_bytes = (
        2 * ((cmid_p * 9 * cin_p + cout * 9 * cmid_p + 9 * cbig * P) * mat_itemsize
             + (cmid_p + cout) * 4)                 # double-buffered constants
        + (cin_p + 9 * cbig) * P * mat_itemsize     # xcat + shared patch scratch
        + (4 << 20))                                # headroom
    budget = _vmem_budget_bytes()
    nb = _choose_images_per_step(N, per_image_io, fixed_bytes, budget)
    grid = (N // nb,)

    kernel = functools.partial(_resblock_kernel, H=H, W=W,
                               res_scale=float(res_scale), nb=nb)

    out_flat = pl.pallas_call(
        kernel,
        out_shape=jax.ShapeDtypeStruct((N, cout, P), x_nchw.dtype),
        grid_spec=pltpu.PrefetchScalarGridSpec(
            num_scalar_prefetch=0,
            grid=grid,
            in_specs=[
                pl.BlockSpec((nb, cx, P), lambda n: (n, 0, 0)),
                pl.BlockSpec((nb, 1, P), lambda n: (n, 0, 0)),
                pl.BlockSpec((cmid_p, 9 * cin_p), lambda n: (0, 0)),
                pl.BlockSpec((cmid_p, 1), lambda n: (0, 0)),
                pl.BlockSpec((cout, 9 * cmid_p), lambda n: (0, 0)),
                pl.BlockSpec((cout, 1), lambda n: (0, 0)),
                pl.BlockSpec((9, cbig, P), lambda n: (0, 0, 0)),
            ],
            out_specs=pl.BlockSpec((nb, cout, P), lambda n: (n, 0, 0)),
            scratch_shapes=[
                pltpu.VMEM((cin_p, P), matmul_dtype),        # xcat staging
                pltpu.VMEM((9 * cbig, P), matmul_dtype),     # shared im2col patches
            ],
        ),
        compiler_params=pltpu.CompilerParams(
            dimension_semantics=("parallel",),
            vmem_limit_bytes=int(budget),
        ),
    )(x_flat, d_flat, w1mat, b1v, w2mat, b2v, masks)

    return out_flat.reshape(N, cout, H, W)


def _reference_forward(x_nchw, disp_nchw, w1, b1, w2, b2, res_scale):
    """Pure-JAX reference matching PyTorch semantics (NCHW, 3x3, pad=1)."""
    xcat = jnp.concatenate([disp_nchw, x_nchw], axis=1)
    y = lax.conv_general_dilated(
        xcat, w1, (1, 1), "SAME",
        dimension_numbers=("NCHW", "HWIO", "NCHW")) + b1.reshape(1, -1, 1, 1)
    y = jnp.maximum(y, 0.0)
    y = lax.conv_general_dilated(
        y, w2, (1, 1), "SAME",
        dimension_numbers=("NCHW", "HWIO", "NCHW")) + b2.reshape(1, -1, 1, 1)
    return x_nchw + y * res_scale


if __name__ == "__main__":
    # Small shapes consistent with the module's forward.
    N, n_feats, expansion, H, W = 2, 4, 2, 16, 16
    res_scale = 1.0
    Cin = n_feats + 1
    Cmid = n_feats * expansion
    Cout = n_feats

    key = jax.random.PRNGKey(0)
    k_x, k_d, k_w1, k_b1, k_w2, k_b2 = jax.random.split(key, 6)

    x = jax.random.normal(k_x, (N, n_feats, H, W), jnp.float32)
    disp = jax.random.normal(k_d, (N, 1, H, W), jnp.float32)

    # Deterministic synthetic parameters (HWIO layout for conv weights).
    w1 = jax.random.normal(k_w1, (3, 3, Cin, Cmid), jnp.float32) * 0.1
    b1 = jax.random.normal(k_b1, (Cmid,), jnp.float32) * 0.1
    w2 = jax.random.normal(k_w2, (3, 3, Cmid, Cout), jnp.float32) * 0.1
    b2 = jax.random.normal(k_b2, (Cout,), jnp.float32) * 0.1

    ref = _reference_forward(x, disp, w1, b1, w2, b2, res_scale)

    # f32 MXU operands (tight-tolerance check).
    out = jax.block_until_ready(resblock_forward(x, disp, w1, b1, w2, b2, res_scale))
    np.testing.assert_allclose(np.asarray(out), np.asarray(ref),
                               rtol=1e-4, atol=1e-4)

    # bf16 operands (v6e/v7x path: bf16 xcat/masks/patches, f32 accumulation).
    out_bf16 = jax.block_until_ready(
        resblock_forward(x, disp, w1, b1, w2, b2, res_scale,
                         matmul_dtype=jnp.bfloat16))
    np.testing.assert_allclose(np.asarray(out_bf16), np.asarray(ref),
                               rtol=3e-2, atol=3e-2)

    print("KERNEL_OK")
</pallas_src>

<mosaic_0001>
module attributes {stable_mosaic.version = 11 : i64} {
  func.func @_resblock_kernel(%arg0: i32, %arg1: memref<1x4x256xf32, #tpu.memory_space<vmem>>, %arg2: memref<1x1x256xf32, #tpu.memory_space<vmem>>, %arg3: memref<8x72xf32, #tpu.memory_space<vmem>>, %arg4: memref<8x1xf32, #tpu.memory_space<vmem>>, %arg5: memref<4x72xf32, #tpu.memory_space<vmem>>, %arg6: memref<4x1xf32, #tpu.memory_space<vmem>>, %arg7: memref<9x8x256xf32, #tpu.memory_space<vmem>>, %arg8: memref<1x4x256xf32, #tpu.memory_space<vmem>>, %arg9: memref<8x256xf32, #tpu.memory_space<vmem>>, %arg10: memref<72x256xf32, #tpu.memory_space<vmem>>) attributes {dimension_semantics = [#tpu.dimension_semantics<parallel>], iteration_bounds = array<i64: 2>, scalar_prefetch = 0 : i64, scratch_operands = 2 : i64, tpu.core_type = #tpu.core_type<tc>, window_params = [{transform_indices = @transform_0, window_bounds = array<i64: 1, 4, 256>}, {transform_indices = @transform_1, window_bounds = array<i64: 1, 1, 256>}, {pipeline_mode = #tpu.pipeline_mode<synchronous>, transform_indices = @transform_2, window_bounds = array<i64: 8, 72>}, {pipeline_mode = #tpu.pipeline_mode<synchronous>, transform_indices = @transform_3, window_bounds = array<i64: 8, 1>}, {pipeline_mode = #tpu.pipeline_mode<synchronous>, transform_indices = @transform_4, window_bounds = array<i64: 4, 72>}, {pipeline_mode = #tpu.pipeline_mode<synchronous>, transform_indices = @transform_5, window_bounds = array<i64: 4, 1>}, {pipeline_mode = #tpu.pipeline_mode<synchronous>, transform_indices = @transform_6, window_bounds = array<i64: 9, 8, 256>}, {transform_indices = @transform_7, window_bounds = array<i64: 1, 4, 256>}]} {
    %cst = arith.constant 0.000000e+00 : f32
    %0 = vector.broadcast %cst : f32 to vector<3x256xf32>
    %c5 = arith.constant 5 : index
    %c0 = arith.constant 0 : index
    %1 = vector.load %arg9[%c5, %c0] : memref<8x256xf32, #tpu.memory_space<vmem>>, vector<3x256xf32>
    tpu.vector_store %arg9[%c5, %c0], %0 {strides = array<i32>} : memref<8x256xf32, #tpu.memory_space<vmem>>, vector<3x256xf32>,
    %c0_0 = arith.constant 0 : index
    %c0_1 = arith.constant 0 : index
    %c0_2 = arith.constant 0 : index
    %2 = vector.load %arg2[%c0_0, %c0_1, %c0_2] : memref<1x1x256xf32, #tpu.memory_space<vmem>>, vector<1x1x256xf32>
    %3 = vector.shape_cast %2 : vector<1x1x256xf32> to vector<1x256xf32>
    %c0_3 = arith.constant 0 : index
    %c0_4 = arith.constant 0 : index
    %4 = vector.load %arg9[%c0_3, %c0_4] : memref<8x256xf32, #tpu.memory_space<vmem>>, vector<1x256xf32>
    tpu.vector_store %arg9[%c0_3, %c0_4], %3 {strides = array<i32>} : memref<8x256xf32, #tpu.memory_space<vmem>>, vector<1x256xf32>,
    %c0_5 = arith.constant 0 : index
    %c0_6 = arith.constant 0 : index
    %c0_7 = arith.constant 0 : index
    %5 = vector.load %arg1[%c0_5, %c0_6, %c0_7] : memref<1x4x256xf32, #tpu.memory_space<vmem>>, vector<1x4x256xf32>
    %6 = vector.shape_cast %5 : vector<1x4x256xf32> to vector<4x256xf32>
    %c1 = arith.constant 1 : index
    %c0_8 = arith.constant 0 : index
    %7 = vector.load %arg9[%c1, %c0_8] : memref<8x256xf32, #tpu.memory_space<vmem>>, vector<4x256xf32>
    tpu.vector_store %arg9[%c1, %c0_8], %6 {strides = array<i32>} : memref<8x256xf32, #tpu.memory_space<vmem>>, vector<4x256xf32>,
    %c0_9 = arith.constant 0 : index
    %c0_10 = arith.constant 0 : index
    %8 = vector.load %arg9[%c0_9, %c0_10] : memref<8x256xf32, #tpu.memory_space<vmem>>, vector<8x256xf32>
    %c17_i32 = arith.constant 17 : i32
    %9 = tpu.dynamic_rotate %8 by %c17_i32 dim 1 : vector<8x256xf32>, i32 -> vector<8x256xf32>
    %c0_11 = arith.constant 0 : index
    %c0_12 = arith.constant 0 : index
    %c0_13 = arith.constant 0 : index
    %10 = vector.load %arg7[%c0_11, %c0_12, %c0_13] : memref<9x8x256xf32, #tpu.memory_space<vmem>>, vector<1x8x256xf32>
    %11 = vector.shape_cast %10 : vector<1x8x256xf32> to vector<8x256xf32>
    %12 = arith.mulf %9, %11 : vector<8x256xf32>
    %c0_14 = arith.constant 0 : index
    %c0_15 = arith.constant 0 : index
    %13 = vector.load %arg10[%c0_14, %c0_15] : memref<72x256xf32, #tpu.memory_space<vmem>>, vector<8x256xf32>
    tpu.vector_store %arg10[%c0_14, %c0_15], %12 {strides = array<i32>} : memref<72x256xf32, #tpu.memory_space<vmem>>, vector<8x256xf32>,
    %c16_i32 = arith.constant 16 : i32
    %14 = tpu.dynamic_rotate %8 by %c16_i32 dim 1 : vector<8x256xf32>, i32 -> vector<8x256xf32>
    %c1_16 = arith.constant 1 : index
    %c0_17 = arith.constant 0 : index
    %c0_18 = arith.constant 0 : index
    %15 = vector.load %arg7[%c1_16, %c0_17, %c0_18] : memref<9x8x256xf32, #tpu.memory_space<vmem>>, vector<1x8x256xf32>
    %16 = vector.shape_cast %15 : vector<1x8x256xf32> to vector<8x256xf32>
    %17 = arith.mulf %14, %16 : vector<8x256xf32>
    %c8 = arith.constant 8 : index
    %c0_19 = arith.constant 0 : index
    %18 = vector.load %arg10[%c8, %c0_19] : memref<72x256xf32, #tpu.memory_space<vmem>>, vector<8x256xf32>
    tpu.vector_store %arg10[%c8, %c0_19], %17 {strides = array<i32>} : memref<72x256xf32, #tpu.memory_space<vmem>>, vector<8x256xf32>,
    %c15_i32 = arith.constant 15 : i32
    %19 = tpu.dynamic_rotate %8 by %c15_i32 dim 1 : vector<8x256xf32>, i32 -> vector<8x256xf32>
    %c2 = arith.constant 2 : index
    %c0_20 = arith.constant 0 : index
    %c0_21 = arith.constant 0 : index
    %20 = vector.load %arg7[%c2, %c0_20, %c0_21] : memref<9x8x256xf32, #tpu.memory_space<vmem>>, vector<1x8x256xf32>
    %21 = vector.shape_cast %20 : vector<1x8x256xf32> to vector<8x256xf32>
    %22 = arith.mulf %19, %21 : vector<8x256xf32>
    %c16 = arith.constant 16 : index
    %c0_22 = arith.constant 0 : index
    %23 = vector.load %arg10[%c16, %c0_22] : memref<72x256xf32, #tpu.memory_space<vmem>>, vector<8x256xf32>
    tpu.vector_store %arg10[%c16, %c0_22], %22 {strides = array<i32>} : memref<72x256xf32, #tpu.memory_space<vmem>>, vector<8x256xf32>,
    %c1_i32 = arith.constant 1 : i32
    %24 = tpu.dynamic_rotate %8 by %c1_i32 dim 1 : vector<8x256xf32>, i32 -> vector<8x256xf32>
    %c3 = arith.constant 3 : index
    %c0_23 = arith.constant 0 : index
    %c0_24 = arith.constant 0 : index
    %25 = vector.load %arg7[%c3, %c0_23, %c0_24] : memref<9x8x256xf32, #tpu.memory_space<vmem>>, vector<1x8x256xf32>
    %26 = vector.shape_cast %25 : vector<1x8x256xf32> to vector<8x256xf32>
    %27 = arith.mulf %24, %26 : vector<8x256xf32>
    %c24 = arith.constant 24 : index
    %c0_25 = arith.constant 0 : index
    %28 = vector.load %arg10[%c24, %c0_25] : memref<72x256xf32, #tpu.memory_space<vmem>>, vector<8x256xf32>
    tpu.vector_store %arg10[%c24, %c0_25], %27 {strides = array<i32>} : memref<72x256xf32, #tpu.memory_space<vmem>>, vector<8x256xf32>,
    %c32 = arith.constant 32 : index
    %c0_26 = arith.constant 0 : index
    %29 = vector.load %arg10[%c32, %c0_26] : memref<72x256xf32, #tpu.memory_space<vmem>>, vector<8x256xf32>
    tpu.vector_store %arg10[%c32, %c0_26], %8 {strides = array<i32>} : memref<72x256xf32, #tpu.memory_space<vmem>>, vector<8x256xf32>,
    %c255_i32 = arith.constant 255 : i32
    %30 = tpu.dynamic_rotate %8 by %c255_i32 dim 1 : vector<8x256xf32>, i32 -> vector<8x256xf32>
    %c5_27 = arith.constant 5 : index
    %c0_28 = arith.constant 0 : index
    %c0_29 = arith.constant 0 : index
    %31 = vector.load %arg7[%c5_27, %c0_28, %c0_29] : memref<9x8x256xf32, #tpu.memory_space<vmem>>, vector<1x8x256xf32>
    %32 = vector.shape_cast %31 : vector<1x8x256xf32> to vector<8x256xf32>
    %33 = arith.mulf %30, %32 : vector<8x256xf32>
    %c40 = arith.constant 40 : index
    %c0_30 = arith.constant 0 : index
    %34 = vector.load %arg10[%c40, %c0_30] : memref<72x256xf32, #tpu.memory_space<vmem>>, vector<8x256xf32>
    tpu.vector_store %arg10[%c40, %c0_30], %33 {strides = array<i32>} : memref<72x256xf32, #tpu.memory_space<vmem>>, vector<8x256xf32>,
    %c241_i32 = arith.constant 241 : i32
    %35 = tpu.dynamic_rotate %8 by %c241_i32 dim 1 : vector<8x256xf32>, i32 -> vector<8x256xf32>
    %c6 = arith.constant 6 : index
    %c0_31 = arith.constant 0 : index
    %c0_32 = arith.constant 0 : index
    %36 = vector.load %arg7[%c6, %c0_31, %c0_32] : memref<9x8x256xf32, #tpu.memory_space<vmem>>, vector<1x8x256xf32>
    %37 = vector.shape_cast %36 : vector<1x8x256xf32> to vector<8x256xf32>
    %38 = arith.mulf %35, %37 : vector<8x256xf32>
    %c48 = arith.constant 48 : index
    %c0_33 = arith.constant 0 : index
    %39 = vector.load %arg10[%c48, %c0_33] : memref<72x256xf32, #tpu.memory_space<vmem>>, vector<8x256xf32>
    tpu.vector_store %arg10[%c48, %c0_33], %38 {strides = array<i32>} : memref<72x256xf32, #tpu.memory_space<vmem>>, vector<8x256xf32>,
    %c240_i32 = arith.constant 240 : i32
    %40 = tpu.dynamic_rotate %8 by %c240_i32 dim 1 : vector<8x256xf32>, i32 -> vector<8x256xf32>
    %c7 = arith.constant 7 : index
    %c0_34 = arith.constant 0 : index
    %c0_35 = arith.constant 0 : index
    %41 = vector.load %arg7[%c7, %c0_34, %c0_35] : memref<9x8x256xf32, #tpu.memory_space<vmem>>, vector<1x8x256xf32>
    %42 = vector.shape_cast %41 : vector<1x8x256xf32> to vector<8x256xf32>
    %43 = arith.mulf %40, %42 : vector<8x256xf32>
    %c56 = arith.constant 56 : index
    %c0_36 = arith.constant 0 : index
    %44 = vector.load %arg10[%c56, %c0_36] : memref<72x256xf32, #tpu.memory_space<vmem>>, vector<8x256xf32>
    tpu.vector_store %arg10[%c56, %c0_36], %43 {strides = array<i32>} : memref<72x256xf32, #tpu.memory_space<vmem>>, vector<8x256xf32>,
    %c239_i32 = arith.constant 239 : i32
    %45 = tpu.dynamic_rotate %8 by %c239_i32 dim 1 : vector<8x256xf32>, i32 -> vector<8x256xf32>
    %c8_37 = arith.constant 8 : index
    %c0_38 = arith.constant 0 : index
    %c0_39 = arith.constant 0 : index
    %46 = vector.load %arg7[%c8_37, %c0_38, %c0_39] : memref<9x8x256xf32, #tpu.memory_space<vmem>>, vector<1x8x256xf32>
    %47 = vector.shape_cast %46 : vector<1x8x256xf32> to vector<8x256xf32>
    %48 = arith.mulf %45, %47 : vector<8x256xf32>
    %c64 = arith.constant 64 : index
    %c0_40 = arith.constant 0 : index
    %49 = vector.load %arg10[%c64, %c0_40] : memref<72x256xf32, #tpu.memory_space<vmem>>, vector<8x256xf32>
    tpu.vector_store %arg10[%c64, %c0_40], %48 {strides = array<i32>} : memref<72x256xf32, #tpu.memory_space<vmem>>, vector<8x256xf32>,
    %c0_41 = arith.constant 0 : index
    %c0_42 = arith.constant 0 : index
    %50 = vector.load %arg3[%c0_41, %c0_42] : memref<8x72xf32, #tpu.memory_space<vmem>>, vector<8x72xf32>
    %c0_43 = arith.constant 0 : index
    %c0_44 = arith.constant 0 : index
    %51 = vector.load %arg10[%c0_43, %c0_44] : memref<72x256xf32, #tpu.memory_space<vmem>>, vector<72x256xf32>
    %cst_45 = arith.constant dense<0.000000e+00> : vector<8x256xf32>
    %52 = tpu.matmul %50, %51, %cst_45 {dimension_numbers = #tpu.dot_dimension_numbers<[1], [0], [0], [1], [0, 0, 1, 1], [], []>} : vector<8x72xf32>, vector<72x256xf32>, vector<8x256xf32> -> vector<8x256xf32>
    %c0_46 = arith.constant 0 : index
    %c0_47 = arith.constant 0 : index
    %53 = vector.load %arg4[%c0_46, %c0_47] : memref<8x1xf32, #tpu.memory_space<vmem>>, vector<8x1xf32>
    %54 = vector.broadcast %53 : vector<8x1xf32> to vector<8x256xf32>
    %55 = arith.addf %52, %54 : vector<8x256xf32>
    %cst_48 = arith.constant 0.000000e+00 : f32
    %56 = vector.broadcast %cst_48 : f32 to vector<8x256xf32>
    %57 = arith.maximumf %55, %56 : vector<8x256xf32>
    %c17_i32_49 = arith.constant 17 : i32
    %58 = tpu.dynamic_rotate %57 by %c17_i32_49 dim 1 : vector<8x256xf32>, i32 -> vector<8x256xf32>
    %c0_50 = arith.constant 0 : index
    %c0_51 = arith.constant 0 : index
    %c0_52 = arith.constant 0 : index
    %59 = vector.load %arg7[%c0_50, %c0_51, %c0_52] : memref<9x8x256xf32, #tpu.memory_space<vmem>>, vector<1x8x256xf32>
    %60 = vector.shape_cast %59 : vector<1x8x256xf32> to vector<8x256xf32>
    %61 = arith.mulf %58, %60 : vector<8x256xf32>
    %c0_53 = arith.constant 0 : index
    %c0_54 = arith.constant 0 : index
    %62 = vector.load %arg10[%c0_53, %c0_54] : memref<72x256xf32, #tpu.memory_space<vmem>>, vector<8x256xf32>
    tpu.vector_store %arg10[%c0_53, %c0_54], %61 {strides = array<i32>} : memref<72x256xf32, #tpu.memory_space<vmem>>, vector<8x256xf32>,
    %c16_i32_55 = arith.constant 16 : i32
    %63 = tpu.dynamic_rotate %57 by %c16_i32_55 dim 1 : vector<8x256xf32>, i32 -> vector<8x256xf32>
    %c1_56 = arith.constant 1 : index
    %c0_57 = arith.constant 0 : index
    %c0_58 = arith.constant 0 : index
    %64 = vector.load %arg7[%c1_56, %c0_57, %c0_58] : memref<9x8x256xf32, #tpu.memory_space<vmem>>, vector<1x8x256xf32>
    %65 = vector.shape_cast %64 : vector<1x8x256xf32> to vector<8x256xf32>
    %66 = arith.mulf %63, %65 : vector<8x256xf32>
    %c8_59 = arith.constant 8 : index
    %c0_60 = arith.constant 0 : index
    %67 = vector.load %arg10[%c8_59, %c0_60] : memref<72x256xf32, #tpu.memory_space<vmem>>, vector<8x256xf32>
    tpu.vector_store %arg10[%c8_59, %c0_60], %66 {strides = array<i32>} : memref<72x256xf32, #tpu.memory_space<vmem>>, vector<8x256xf32>,
    %c15_i32_61 = arith.constant 15 : i32
    %68 = tpu.dynamic_rotate %57 by %c15_i32_61 dim 1 : vector<8x256xf32>, i32 -> vector<8x256xf32>
    %c2_62 = arith.constant 2 : index
    %c0_63 = arith.constant 0 : index
    %c0_64 = arith.constant 0 : index
    %69 = vector.load %arg7[%c2_62, %c0_63, %c0_64] : memref<9x8x256xf32, #tpu.memory_space<vmem>>, vector<1x8x256xf32>
    %70 = vector.shape_cast %69 : vector<1x8x256xf32> to vector<8x256xf32>
    %71 = arith.mulf %68, %70 : vector<8x256xf32>
    %c16_65 = arith.constant 16 : index
    %c0_66 = arith.constant 0 : index
    %72 = vector.load %arg10[%c16_65, %c0_66] : memref<72x256xf32, #tpu.memory_space<vmem>>, vector<8x256xf32>
    tpu.vector_store %arg10[%c16_65, %c0_66], %71 {strides = array<i32>} : memref<72x256xf32, #tpu.memory_space<vmem>>, vector<8x256xf32>,
    %c1_i32_67 = arith.constant 1 : i32
    %73 = tpu.dynamic_rotate %57 by %c1_i32_67 dim 1 : vector<8x256xf32>, i32 -> vector<8x256xf32>
    %c3_68 = arith.constant 3 : index
    %c0_69 = arith.constant 0 : index
    %c0_70 = arith.constant 0 : index
    %74 = vector.load %arg7[%c3_68, %c0_69, %c0_70] : memref<9x8x256xf32, #tpu.memory_space<vmem>>, vector<1x8x256xf32>
    %75 = vector.shape_cast %74 : vector<1x8x256xf32> to vector<8x256xf32>
    %76 = arith.mulf %73, %75 : vector<8x256xf32>
    %c24_71 = arith.constant 24 : index
    %c0_72 = arith.constant 0 : index
    %77 = vector.load %arg10[%c24_71, %c0_72] : memref<72x256xf32, #tpu.memory_space<vmem>>, vector<8x256xf32>
    tpu.vector_store %arg10[%c24_71, %c0_72], %76 {strides = array<i32>} : memref<72x256xf32, #tpu.memory_space<vmem>>, vector<8x256xf32>,
    %c32_73 = arith.constant 32 : index
    %c0_74 = arith.constant 0 : index
    %78 = vector.load %arg10[%c32_73, %c0_74] : memref<72x256xf32, #tpu.memory_space<vmem>>, vector<8x256xf32>
    tpu.vector_store %arg10[%c32_73, %c0_74], %57 {strides = array<i32>} : memref<72x256xf32, #tpu.memory_space<vmem>>, vector<8x256xf32>,
    %c255_i32_75 = arith.constant 255 : i32
    %79 = tpu.dynamic_rotate %57 by %c255_i32_75 dim 1 : vector<8x256xf32>, i32 -> vector<8x256xf32>
    %c5_76 = arith.constant 5 : index
    %c0_77 = arith.constant 0 : index
    %c0_78 = arith.constant 0 : index
    %80 = vector.load %arg7[%c5_76, %c0_77, %c0_78] : memref<9x8x256xf32, #tpu.memory_space<vmem>>, vector<1x8x256xf32>
    %81 = vector.shape_cast %80 : vector<1x8x256xf32> to vector<8x256xf32>
    %82 = arith.mulf %79, %81 : vector<8x256xf32>
    %c40_79 = arith.constant 40 : index
    %c0_80 = arith.constant 0 : index
    %83 = vector.load %arg10[%c40_79, %c0_80] : memref<72x256xf32, #tpu.memory_space<vmem>>, vector<8x256xf32>
    tpu.vector_store %arg10[%c40_79, %c0_80], %82 {strides = array<i32>} : memref<72x256xf32, #tpu.memory_space<vmem>>, vector<8x256xf32>,
    %c241_i32_81 = arith.constant 241 : i32
    %84 = tpu.dynamic_rotate %57 by %c241_i32_81 dim 1 : vector<8x256xf32>, i32 -> vector<8x256xf32>
    %c6_82 = arith.constant 6 : index
    %c0_83 = arith.constant 0 : index
    %c0_84 = arith.constant 0 : index
    %85 = vector.load %arg7[%c6_82, %c0_83, %c0_84] : memref<9x8x256xf32, #tpu.memory_space<vmem>>, vector<1x8x256xf32>
    %86 = vector.shape_cast %85 : vector<1x8x256xf32> to vector<8x256xf32>
    %87 = arith.mulf %84, %86 : vector<8x256xf32>
    %c48_85 = arith.constant 48 : index
    %c0_86 = arith.constant 0 : index
    %88 = vector.load %arg10[%c48_85, %c0_86] : memref<72x256xf32, #tpu.memory_space<vmem>>, vector<8x256xf32>
    tpu.vector_store %arg10[%c48_85, %c0_86], %87 {strides = array<i32>} : memref<72x256xf32, #tpu.memory_space<vmem>>, vector<8x256xf32>,
    %c240_i32_87 = arith.constant 240 : i32
    %89 = tpu.dynamic_rotate %57 by %c240_i32_87 dim 1 : vector<8x256xf32>, i32 -> vector<8x256xf32>
    %c7_88 = arith.constant 7 : index
    %c0_89 = arith.constant 0 : index
    %c0_90 = arith.constant 0 : index
    %90 = vector.load %arg7[%c7_88, %c0_89, %c0_90] : memref<9x8x256xf32, #tpu.memory_space<vmem>>, vector<1x8x256xf32>
    %91 = vector.shape_cast %90 : vector<1x8x256xf32> to vector<8x256xf32>
    %92 = arith.mulf %89, %91 : vector<8x256xf32>
    %c56_91 = arith.constant 56 : index
    %c0_92 = arith.constant 0 : index
    %93 = vector.load %arg10[%c56_91, %c0_92] : memref<72x256xf32, #tpu.memory_space<vmem>>, vector<8x256xf32>
    tpu.vector_store %arg10[%c56_91, %c0_92], %92 {strides = array<i32>} : memref<72x256xf32, #tpu.memory_space<vmem>>, vector<8x256xf32>,
    %c239_i32_93 = arith.constant 239 : i32
    %94 = tpu.dynamic_rotate %57 by %c239_i32_93 dim 1 : vector<8x256xf32>, i32 -> vector<8x256xf32>
    %c8_94 = arith.constant 8 : index
    %c0_95 = arith.constant 0 : index
    %c0_96 = arith.constant 0 : index
    %95 = vector.load %arg7[%c8_94, %c0_95, %c0_96] : memref<9x8x256xf32, #tpu.memory_space<vmem>>, vector<1x8x256xf32>
    %96 = vector.shape_cast %95 : vector<1x8x256xf32> to vector<8x256xf32>
    %97 = arith.mulf %94, %96 : vector<8x256xf32>
    %c64_97 = arith.constant 64 : index
    %c0_98 = arith.constant 0 : index
    %98 = vector.load %arg10[%c64_97, %c0_98] : memref<72x256xf32, #tpu.memory_space<vmem>>, vector<8x256xf32>
    tpu.vector_store %arg10[%c64_97, %c0_98], %97 {strides = array<i32>} : memref<72x256xf32, #tpu.memory_space<vmem>>, vector<8x256xf32>,
    %c0_99 = arith.constant 0 : index
    %c0_100 = arith.constant 0 : index
    %99 = vector.load %arg5[%c0_99, %c0_100] : memref<4x72xf32, #tpu.memory_space<vmem>>, vector<4x72xf32>
    %c0_101 = arith.constant 0 : index
    %c0_102 = arith.constant 0 : index
    %100 = vector.load %arg10[%c0_101, %c0_102] : memref<72x256xf32, #tpu.memory_space<vmem>>, vector<72x256xf32>
    %cst_103 = arith.constant dense<0.000000e+00> : vector<4x256xf32>
    %101 = tpu.matmul %99, %100, %cst_103 {dimension_numbers = #tpu.dot_dimension_numbers<[1], [0], [0], [1], [0, 0, 1, 1], [], []>} : vector<4x72xf32>, vector<72x256xf32>, vector<4x256xf32> -> vector<4x256xf32>
    %c0_104 = arith.constant 0 : index
    %c0_105 = arith.constant 0 : index
    %102 = vector.load %arg6[%c0_104, %c0_105] : memref<4x1xf32, #tpu.memory_space<vmem>>, vector<4x1xf32>
    %103 = vector.broadcast %102 : vector<4x1xf32> to vector<4x256xf32>
    %104 = arith.addf %101, %103 : vector<4x256xf32>
    %c0_106 = arith.constant 0 : index
    %c0_107 = arith.constant 0 : index
    %c0_108 = arith.constant 0 : index
    %105 = vector.load %arg1[%c0_106, %c0_107, %c0_108] : memref<1x4x256xf32, #tpu.memory_space<vmem>>, vector<1x4x256xf32>
    %106 = vector.shape_cast %105 : vector<1x4x256xf32> to vector<4x256xf32>
    %cst_109 = arith.constant 1.000000e+00 : f32
    %107 = vector.broadcast %cst_109 : f32 to vector<4x256xf32>
    %108 = arith.mulf %104, %107 : vector<4x256xf32>
    %109 = arith.addf %106, %108 : vector<4x256xf32>
    %c0_110 = arith.constant 0 : index
    %c0_111 = arith.constant 0 : index
    %c0_112 = arith.constant 0 : index
    %110 = vector.load %arg8[%c0_110, %c0_111, %c0_112] : memref<1x4x256xf32, #tpu.memory_space<vmem>>, vector<1x4x256xf32>
    %111 = vector.shape_cast %110 : vector<1x4x256xf32> to vector<4x256xf32>
    %112 = vector.shape_cast %109 : vector<4x256xf32> to vector<1x4x256xf32>
    tpu.vector_store %arg8[%c0_110, %c0_111, %c0_112], %112 {strides = array<i32>} : memref<1x4x256xf32, #tpu.memory_space<vmem>>, vector<1x4x256xf32>,
    return
  }
  func.func @transform_0(%arg0: i32) -> (i32, i32, i32) {
    %c0_i32 = arith.constant 0 : i32
    %c0_i32_0 = arith.constant 0 : i32
    %c0_i32_1 = arith.constant 0 : i32
    return %arg0, %c0_i32, %c0_i32_0 : i32, i32, i32
  }
  func.func @transform_1(%arg0: i32) -> (i32, i32, i32) {
    %c0_i32 = arith.constant 0 : i32
    %c0_i32_0 = arith.constant 0 : i32
    %c0_i32_1 = arith.constant 0 : i32
    return %arg0, %c0_i32, %c0_i32_0 : i32, i32, i32
  }
  func.func @transform_2(%arg0: i32) -> (i32, i32) {
    %c0_i32 = arith.constant 0 : i32
    %c0_i32_0 = arith.constant 0 : i32
    %c0_i32_1 = arith.constant 0 : i32
    return %c0_i32, %c0_i32_0 : i32, i32
  }
  func.func @transform_3(%arg0: i32) -> (i32, i32) {
    %c0_i32 = arith.constant 0 : i32
    %c0_i32_0 = arith.constant 0 : i32
    %c0_i32_1 = arith.constant 0 : i32
    return %c0_i32, %c0_i32_0 : i32, i32
  }
  func.func @transform_4(%arg0: i32) -> (i32, i32) {
    %c0_i32 = arith.constant 0 : i32
    %c0_i32_0 = arith.constant 0 : i32
    %c0_i32_1 = arith.constant 0 : i32
    return %c0_i32, %c0_i32_0 : i32, i32
  }
  func.func @transform_5(%arg0: i32) -> (i32, i32) {
    %c0_i32 = arith.constant 0 : i32
    %c0_i32_0 = arith.constant 0 : i32
    %c0_i32_1 = arith.constant 0 : i32
    return %c0_i32, %c0_i32_0 : i32, i32
  }
  func.func @transform_6(%arg0: i32) -> (i32, i32, i32) {
    %c0_i32 = arith.constant 0 : i32
    %c0_i32_0 = arith.constant 0 : i32
    %c0_i32_1 = arith.constant 0 : i32
    %c0_i32_2 = arith.constant 0 : i32
    return %c0_i32, %c0_i32_0, %c0_i32_1 : i32, i32, i32
  }
  func.func @transform_7(%arg0: i32) -> (i32, i32, i32) {
    %c0_i32 = arith.constant 0 : i32
    %c0_i32_0 = arith.constant 0 : i32
    %c0_i32_1 = arith.constant 0 : i32
    return %arg0, %c0_i32, %c0_i32_0 : i32, i32, i32
  }
}

</mosaic_0001>

<bundles_post_ra>
// kernel: tpu_custom_call.1
= control target key start
LH: loop header
LB: loop body
LE: loop exit
PB: predicated region body
PF: predicated region fallthrough
CT: control target
= control target key end

     0   :  { %s1527_s0 = inlined_call_operand.hbm [shape: f32[2,4,256], index: 0, kind: input, shape index: {}]   ;;  %s1528_s1 = inlined_call_operand.vmem [shape: f32[2,1,256], index: 1, kind: input, shape index: {}]   ;;  %s1529_s2 = inlined_call_operand.vmem [shape: f32[8,72], index: 2, kind: input, shape index: {}]   ;;  %s1530_s3 = inlined_call_operand.vmem [shape: f32[8,1], index: 3, kind: input, shape index: {}]   ;;  %s1531_s4 = inlined_call_operand.hbm [shape: f32[4,72], index: 4, kind: input, shape index: {}]   ;;  %s1532_s5 = inlined_call_operand.vmem [shape: f32[4,1], index: 5, kind: input, shape index: {}]   ;;  %s1533_s6 = inlined_call_operand.hbm [shape: f32[9,8,256], index: 6, kind: input, shape index: {}]   ;;  %s1534_s7 = inlined_call_operand.hbm [shape: f32[2,4,256], index: 7, kind: output, shape index: {}]  }
   0x1   :  { %1535 = sst [smem:[#allocation14_spill]] %s1531_s4 }
   0x2   :  { %12 = vsyncpa [#allocation5], 0 }
   0x3   :  { %14 = vsyncpa [#allocation5 + $0x1], 0 }
   0x4   :  { %15 = vsyncpa [#allocation8], 0 }
   0x5   :  { %16 = vsyncpa [#allocation6], 0 }
   0x6   :  { %18 = vsyncpa [#allocation6 + $0x1], 0  ;;  %s1168_s24 = smov 0   ;;  %s1170_s25 = smov 0  }
   0x7   :  { %s1172_s26 = smov 0   ;;  %s1174_s27 = smov 0  }
   0x8 LB: > { %s1189_s28 = sadd.s32 4294967295, %s1112_s27   ;;  %s846_s29 = sadd.s32 4294967294, %s1112_s27   ;;  %s1112_s27 = sphi %s1174_s27, %s1546_s27   ;;  %s1108_s26 = sphi %s1172_s26, %s1545_s26   ;;  %s1104_s25 = sphi %s1170_s25, %s1544_s25   ;;  %s1100_s24 = sphi %s1168_s24, %s1543_s24  }
   0x9   : > { %p44_p0 = scmp.ne.s32.totalorder %s1104_s25, %s1100_s24  ;;  %p45_p1 = scmp.eq.s32.totalorder %s1189_s28, 0 }
   0xa   : > { %p199_p2 = scmp.eq.s32.totalorder %s1189_s28, 1  ;;  %p205_p3 = scmp.eq.s32.totalorder %s846_s29, 1 }
   0xb   : > { %p1198_p4 = por %p45_p1, %p44_p0  ;;  %p847_p5 = scmp.ge.s32.totalorder %s1112_s27, 1 }
   0xc   : > { %p1203_p6 = por %p205_p3, %p44_p0  ;;  %p212_p7 = scmp.lt.s32.totalorder %s1112_s27, 3 }
   0xd   : > { %s1538_s4 = sld [smem:[#allocation14_spill]]  ;;  %s1114_s13 = smov [#allocation7]  }
   0xe   : > { %p1211_p8 = pnand %p847_p5, %p212_p7  ;;  %s232_s14 = sshll.u32 %s1114_s13, 4  ;;  %s233_s14 = int_to_ptr.vmem [resolvable:$true] %s232_s14 }
   0xf   : > { %s244_s17 = sshll.u32 %s1533_s6, 4  ;;  %s1115_s18 = smov [#allocation9]   ;;  %s245_s17 = int_to_ptr.hbm [resolvable:$true] %s244_s17 }
  0x10   : > { %p883_p10 = pneg %p1211_p8  ;;  %s246_s19 = sshll.u32 %s1115_s18, 4  ;;  %s247_s19 = int_to_ptr.vmem [resolvable:$true] %s246_s19 }
  0x11   : > { %s1116_s20 = smov 256   ;;  %s1117_s21 = smov 16  }
  0x12   : > { %p884_p11 = pnand %p883_p10, %p45_p1  ;;  %s1224_s22 = sadd.s32 1, %s1112_s27  }
  0x13   : > { %s230_s11 = sshll.u32 %s1538_s4, 4  ;;  %s28_s23 = ssub.s32 %s1112_s27, %s1224_s22  ;;  %s231_s11 = int_to_ptr.hbm [resolvable:$true] %s230_s11 }
  0x14   : > { %886 = dma.hbm_to_vmem [thread:$0]  (!%p884_p11), %s231_s11, 64, %s233_s14, [#allocation8]  }
  0x15   : > { %889 = dma.hbm_to_vmem [thread:$0]  (!%p884_p11), %s245_s17, 2304, %s247_s19, [#allocation8], %s1116_s20, %s1116_s20, %s1117_s21  }
  0x16   : > { %p29_p12 = scmp.eq.s32.totalorder %s28_s23, 0  ;;  %s31_s29 = sadd.s32 1, %s1108_s26 }
  0x17   : > { %p38_p13 = scmp.ne.s32.totalorder %s1108_s26, %s1104_s25  ;;  %p39_p0 = scmp.eq.s32.totalorder %s1112_s27, 0 }
  0x18   : > { %s1233_s9 = scalar_select %p29_p12, %s1108_s26, %s31_s29  }
  0x19   : > { %p40_p3 = por %p39_p0, %p38_p13  ;;  %p1237_p5 = por %p199_p2, %p38_p13 }
  0x1a   : > { %p900_p7 = scmp.lt.s32.totalorder %s1112_s27, 2  ;;  %s260_s11 = sand.u32 1, %s1108_s26  }
  0x1b   : > { %s851_s13 = sshll.u32 %s260_s11, 3  ;;  %s869_s14 = sshll.u32 %s1112_s27, 3 }
  0x1c   : > { %s269_s17 = scalar_lea.hbm %s1527_s0, %s869_s14  ;;  %s264_s18 = scalar_lea.vmem [#allocation4], %s851_s13 }
  0x1d   : > { %s273_s19 = sshll.u32 %s264_s18, 4  ;;  %s271_s20 = sshll.u32 %s269_s17, 4  ;;  %s274_s19 = int_to_ptr.vmem [resolvable:$true] %s273_s19  ;;  %s272_s20 = int_to_ptr.hbm [resolvable:$true] %s271_s20 }
  0x1e   : > { %p1247_p10 = pnand %p900_p7, %p40_p3  ;;  %s261_s23 = scalar_lea.sflag [#allocation5], %s260_s11 }
  0x1f   : > { %s1012_s29 = sshra.s32 %s272_s20, 4  ;;  %s1019_s15 = scalar_lea.hbm %s1527_s0, 16  ;;  %s1013_s29 = int_to_ptr.hbm [resolvable:$true] %s1012_s29 }
  0x20   : > { %s1014_s4 = scalar_lea.hbm %s1013_s29, 8  ;;  %p1016_p11 = pneg %p1247_p10 }
  0x21   : > { %p1015_p2 = scmp.ne.s32.totalorder %s1013_s29, %s1014_s4  ;;  %p1020_p0 = scmp.lt.s32.totalorder %s1013_s29, %s1527_s0 }
  0x22   : > { %p1021_p3 = scmp.lt.s32.totalorder %s1019_s15, %s1014_s4 }
  0x23   : > { %p1017_p12 = pnand %p1016_p11, %p1015_p2 }
  0x24   : > { %p1022_p7 = por %p1021_p3, %p1020_p0 }
  0x25   : > { %p1018_p13 = pneg %p1017_p12 }
  0x27   : > { %p1023_p9 = pnand %p1022_p7, %p1018_p13 }
  0x29   : > { %1026 = shalt.err (!%p1023_p9)
}
  0x2a   : > { %893 = dma.hbm_to_vmem [thread:$0]  (!%p1247_p10), %s272_s20, 128, %s274_s19, %s261_s23  }
  0x2b   : > { %289 = sbr.rel (%p1211_p8) target bundleno = 657 (0x291), region = 48  ;;  %s1264_s11 = sand.u32 (!%p1211_p8), 1, %s1104_s25  }
  0x2c   : > { %s855_s18 = sshll.u32 (!%p1211_p8), %s1264_s11, 3  ;;  %s292_s14 = scalar_lea.sflag (!%p1211_p8), [#allocation5], %s1264_s11 }
  0x2d   : > { %s295_s4 = scalar_lea.vmem (!%p1211_p8), [#allocation4], %s855_s18 }
  0x30   : > { %1087 = dma.done.wait (%p1198_p4), %s292_s14, 128  }
  0x31   : > { %1089 = vsyncadd (%p1198_p4), %s292_s14, 4294967168 }
  0x32   : > { %1091 = dma.done.wait (%p45_p1), [#allocation8], 2368  }
  0x33   : > { %1093 = vsyncadd (%p45_p1), [#allocation8], 4294964928  ;;  %p341_p8 = scmp.lt.s32.totalorder %s1189_s28, 1  ;;  %v1118_v0 = vmov 0.0   ;;  %v348_v1 = vlaneseq  ;;  %v1283_v3 = vld [vmem:[%s295_s4] sm:$0xff]  ;;  %s1119_s23 = smov 112  }
  0x34   : > { %345 = vst [vmem:[#allocation2] sm:$0xe0] %v1118_v0  ;;  %s1120_s29 = smov 111   ;;  %s1121_s13 = smov 113   ;;  %v1326_v15 = vld [vmem:[#allocation9 + $0x80] sm:$0xff]  ;;  %v1328_v16 = vld [vmem:[#allocation9 + $0x88] sm:$0xff] }
  0x35   : > { %s342_s12 = scalar_select %p341_p8, %s1189_s28, 1  ;;  %346 = vst [vmem:[#allocation2 + $0x8] sm:$0xe0] %v1118_v0  ;;  %vm350_vm0 = vcmp.lt.s32.totalorder %v348_v1, 256  ;;  %v1322_v13 = vand.u32 127, %v348_v1  ;;  %v1339_v23 = vld [vmem:[#allocation9 + $0x70] sm:$0xff] }
  0x36   : > { %356 = vst [vmem:[#allocation1] ss:$2 sm:$0xff] %v1283_v3  ;;  %s1122_s15 = smov 127   ;;  %s1123_s16 = smov 1   ;;  %v1341_v24 = vld [vmem:[#allocation9 + $0x78] sm:$0xff]  ;;  %v1349_v29 = vld [vmem:[#allocation9 + $0x60] sm:$0xff] }
  0x37   : > { %s859_s19 = sshll.u32 %s342_s12, 1  ;;  %s1124_s17 = smov 15   ;;  %vm458_vm1 = vcmp.lt.s32.totalorder %v1322_v13, 112  ;;  %vm472_vm2 = vcmp.lt.s32.totalorder %v1322_v13, 111  ;;  %vm444_vm3 = vcmp.lt.s32.totalorder %v1322_v13, 113  ;;  %v1351_v30 = vld [vmem:[#allocation9 + $0x68] sm:$0xff] }
  0x38   : > { %s344_s30 = scalar_lea.vmem %s1528_s1, %s859_s19  ;;  %s1125_s14 = smov 16   ;;  %vm430_vm4 = vcmp.lt.s32.totalorder %v1322_v13, 127  ;;  %v501_v36 = vld [vmem:[%s1530_s3] sm:$0xff]  ;;  %v1127_v39 = vmov 0   ;;  %vm414_vm5 = vcmp.lt.s32.totalorder %v1322_v13, 1  ;;  %vm400_vm6 = vcmp.lt.s32.totalorder %v1322_v13, 15 }
  0x39   : > { %v347_v2 = vld [vmem:[%s344_s30] sm:$0x3]  ;;  %s1126_s4 = smov 17   ;;  %v1363_v38 = vld [vmem:[#allocation9 + $0x58] sm:$0xff]  ;;  %950 = vset.pattern.permute.xlu1 %v1127_v39  ;;  %951 = vset.pattern.permute.xlu0 %v1127_v39  ;;  %v1379_v49 = vld [vmem:[#allocation9 + $0x20] sm:$0xff]  ;;  %vm386_vm7 = vcmp.lt.s32.totalorder %v1322_v13, 16 }
  0x3a   : > { %352 = vst.msk [vmem:[#allocation2] ss:$8 sm:$0x3] %vm350_vm0, %v347_v2  ;;  %v1361_v37 = vld [vmem:[#allocation9 + $0x50] sm:$0xff]  ;;  %v1377_v48 = vld [vmem:[#allocation9 + $0x38] sm:$0xff]  ;;  %v1381_v50 = vld [vmem:[#allocation9 + $0x28] sm:$0xff] }
  0x3b   : > { %v1374_v46 = vld [vmem:[#allocation9 + $0x30] sm:$0xff]  ;;  %v1398_v62 = vld [vmem:[#allocation9 + $0x18] sm:$0xff]  ;;  %vm373_vm8 = vcmp.lt.s32.totalorder %v1322_v13, 17  ;;  %vm507_vm9 = vcmask 588800   ;;  %vm723_vm10 = vcmask 1043456  }
  0x3c   : > { %v1396_v61 = vld [vmem:[#allocation9 + $0x10] sm:$0xff] }
  0x3d   : > { %v357_v4 = vld.sshfl [vmem:[#allocation1] sm:$0xff pattern:$0x75316420]  ;;  %v358_v5 = vld.sshfl [vmem:[#allocation1 + $0x8] sm:$0xff pattern:$0x75316420] }
  0x3e   : > { %v359_v6 = vrot.slane %v357_v4, 7  ;;  %v360_v7 = vrot.slane %v358_v5, 7 }
  0x40   : > { %363 = vst [vmem:[#allocation2] sm:$0x1e] %v359_v6 }
  0x41   : > { %364 = vst [vmem:[#allocation2 + $0x8] sm:$0x1e] %v360_v7  ;;  %v1407_v7 = vld [vmem:[#allocation9] sm:$0xff] }
  0x47   : > { %v1286_v8 = vld [vmem:[#allocation2] sm:$0xff] }
  0x48   : > { %454 = vrot.lane.b32.xlu1 %v1286_v8, %s1119_s23  ;;  %468 = vrot.lane.b32.xlu0 %v1286_v8, %s1120_s29  ;;  %v1294_v9 = vld [vmem:[#allocation2 + $0x8] sm:$0xff] }
  0x49   : > { %440 = vrot.lane.b32.xlu2 %v1286_v8, %s1121_s13 }
  0x50   : > { %456 = vrot.lane.b32.xlu1 %v1294_v9, %s1119_s23  ;;  %470 = vrot.lane.b32.xlu0 %v1294_v9, %s1120_s29 }
  0x51   : > { %442 = vrot.lane.b32.xlu2 %v1294_v9, %s1121_s13 }
  0x58   : > { %428 = vrot.lane.b32.xlu1 %v1294_v9, %s1122_s15  ;;  %426 = vrot.lane.b32.xlu0 %v1286_v8, %s1122_s15 }
  0x59   : > { %410 = vrot.lane.b32.xlu2 %v1286_v8, %s1123_s16 }
  0x60   : > { %396 = vrot.lane.b32.xlu1 %v1286_v8, %s1124_s17  ;;  %412 = vrot.lane.b32.xlu0 %v1294_v9, %s1123_s16 }
  0x61   : > { %398 = vrot.lane.b32.xlu2 %v1294_v9, %s1124_s17 }
  0x68   : > { %384 = vrot.lane.b32.xlu1 %v1294_v9, %s1125_s14  ;;  %382 = vrot.lane.b32.xlu0 %v1286_v8, %s1125_s14 }
  0x69   : > { %367 = vrot.lane.b32.xlu2 %v1286_v8, %s1126_s4 }
  0x70   : > { %369 = vrot.lane.b32.xlu0 %v1294_v9, %s1126_s4  ;;  %504 = vperm.xlu1 %950, %v501_v36  }
  0xa3   : > { %v441_v10 = vpop.permute.xlu2 %440 }
  0xab   : > { %v443_v14 = vpop.permute.xlu2 %442 }
  0xac   : > { %v445_v27 = vsel %vm444_vm3, %v441_v10, %v443_v14  ;;  %v446_v28 = vsel %vm444_vm3, %v443_v14, %v441_v10 }
  0xad   : > { %v450_v34 = vmul.f32 %v1349_v29, %v445_v27  ;;  %v451_v35 = vmul.f32 %v1351_v30, %v446_v28 }
  0xb3   : > { %v411_v33 = vpop.permute.xlu2 %410 }
  0xba   : > { %v455_v11 = vpop.permute.xlu1 %454  ;;  %v469_v12 = vpop.permute.xlu0 %468 }
  0xbb   : > { %v399_v47 = vpop.permute.xlu2 %398 }
  0xc2   : > { %v457_v17 = vpop.permute.xlu1 %456  ;;  %v471_v18 = vpop.permute.xlu0 %470 }
  0xc3   : > { %v459_v19 = vsel %vm458_vm1, %v455_v11, %v457_v17  ;;  %v460_v20 = vsel %vm458_vm1, %v457_v17, %v455_v11  ;;  %v473_v21 = vsel %vm472_vm2, %v469_v12, %v471_v18  ;;  %v474_v22 = vsel %vm472_vm2, %v471_v18, %v469_v12  ;;  %v368_v6 = vpop.permute.xlu2 %367  ;;  %v482_v17 = vld [vmem:[%s1529_s2] sm:$0xff] }
  0xc4   : > { %v478_v25 = vmul.f32 %v1326_v15, %v473_v21  ;;  %v479_v26 = vmul.f32 %v1328_v16, %v474_v22  ;;  %v464_v31 = vmul.f32 %v1339_v23, %v459_v19  ;;  %v465_v32 = vmul.f32 %v1341_v24, %v460_v20 }
  0xc6   : > { %518 = vmatpush.msra.mxu0 %v478_v25  ;;  %538 = vmatpush.msra.mxu1 %v479_v26 }
  0xc8   : > { %519 = vmatpush.msra.mxu0 %v464_v31  ;;  %539 = vmatpush.msra.mxu1 %v465_v32 }
  0xca   : > { %v429_v40 = vpop.permute.xlu1 %428  ;;  %520 = vmatpush.msra.mxu0 %v450_v34  ;;  %540 = vmatpush.msra.mxu1 %v451_v35  ;;  %v427_v41 = vpop.permute.xlu0 %426 }
  0xcb   : > { %v431_v42 = vsel %vm430_vm4, %v427_v41, %v429_v40  ;;  %v432_v43 = vsel %vm430_vm4, %v429_v40, %v427_v41 }
  0xcc   : > { %v436_v44 = vmul.f32 %v1361_v37, %v431_v42  ;;  %v437_v45 = vmul.f32 %v1363_v38, %v432_v43 }
  0xce   : > { %521 = vmatpush.msra.mxu0 %v436_v44  ;;  %541 = vmatpush.msra.mxu1 %v437_v45  ;;  %v670_v45 = vld [vmem:[%s1532_s5] sm:$0xf] }
  0xd0   : > { %522 = vmatpush.msra.mxu0 %v1286_v8  ;;  %542 = vmatpush.msra.mxu1 %v1294_v9  ;;  %v1409_v8 = vld [vmem:[#allocation9 + $0x8] sm:$0xff] }
  0xd2   : > { %v397_v51 = vpop.permute.xlu1 %396  ;;  %v413_v52 = vpop.permute.xlu0 %412 }
  0xd3   : > { %v415_v53 = vsel %vm414_vm5, %v411_v33, %v413_v52  ;;  %v416_v54 = vsel %vm414_vm5, %v413_v52, %v411_v33  ;;  %v401_v55 = vsel %vm400_vm6, %v397_v51, %v399_v47  ;;  %v402_v56 = vsel %vm400_vm6, %v399_v47, %v397_v51 }
  0xd4   : > { %v420_v57 = vmul.f32 %v1374_v46, %v416_v54  ;;  %v421_v58 = vmul.f32 %v1377_v48, %v415_v53  ;;  %v406_v59 = vmul.f32 %v1379_v49, %v402_v56  ;;  %v407_v60 = vmul.f32 %v1381_v50, %v401_v55 }
  0xd6   : > { %523 = vmatpush.msra.mxu0 %v420_v57  ;;  %543 = vmatpush.msra.mxu1 %v421_v58 }
  0xd8   : > { %524 = vmatpush.msra.mxu0 %v406_v59  ;;  %544 = vmatpush.msra.mxu1 %v407_v60 }
  0xda   : > { %v385_v63 = vpop.permute.xlu1 %384  ;;  %v383_v0 = vpop.permute.xlu0 %382 }
  0xdb   : > { %v387_v1 = vsel %vm386_vm7, %v383_v0, %v385_v63  ;;  %v388_v2 = vsel %vm386_vm7, %v385_v63, %v383_v0 }
  0xdc   : > { %v392_v4 = vmul.f32 %v1396_v61, %v388_v2  ;;  %v393_v5 = vmul.f32 %v1398_v62, %v387_v1 }
  0xde   : > { %525 = vmatpush.msra.mxu0 %v392_v4  ;;  %545 = vmatpush.msra.mxu1 %v393_v5 }
  0xe2   : > { %v370_v9 = vpop.permute.xlu0 %369  ;;  %v505_v18 = vpop.permute.xlu1 %504 }
  0xe3   : > { %v374_v10 = vsel %vm373_vm8, %v368_v6, %v370_v9  ;;  %v375_v11 = vsel %vm373_vm8, %v370_v9, %v368_v6 }
  0xe4   : > { %v378_v12 = vmul.f32 %v1407_v7, %v375_v11  ;;  %v379_v14 = vmul.f32 %v1409_v8, %v374_v10 }
  0xe6   : > { %526 = vmatpush.msra.mxu0 %v378_v12  ;;  %546 = vmatpush.msra.mxu1 %v379_v14  ;;  %v651_v14 = vld [vmem:[#allocation7] sm:$0xf] }
  0xe7   : > { %860 = vmatmul.msk.f32.vlgmr.msra.gmra.mxu0 %vm507_vm9, %v482_v17  ;;  %861 = vmatmul.msk.f32.vlgmr.msra.gmra.mxu1 %vm507_vm9, %v482_v17 }
 0x164   : > { %v528_v19 = vpop.f32.mrf.mxu0  ;;  %v548_v20 = vpop.f32.mrf.mxu1 }
 0x165   : > { %v529_v21 = vadd.f32 %v528_v19, %v505_v18  ;;  %v549_v22 = vadd.f32 %v548_v20, %v505_v18 }
 0x167   : > { %v551_v25 = vmax.f32 %v529_v21, 0.0  ;;  %v552_v26 = vmax.f32 %v549_v22, 0.0 }
 0x169   : > { %627 = vrot.lane.b32.xlu1 %v551_v25, %s1119_s23  ;;  %639 = vrot.lane.b32.xlu2 %v551_v25, %s1120_s29 }
 0x16a   : > { %641 = vrot.lane.b32.xlu0 %v552_v26, %s1120_s29  ;;  %s870_s29 = sshll.u32 %s1189_s28, 3  ;;  %s729_s28 = scalar_lea.sflag [#allocation6], %s1264_s11 }
 0x171   : > { %617 = vrot.lane.b32.xlu1 %v552_v26, %s1121_s13  ;;  %629 = vrot.lane.b32.xlu2 %v552_v26, %s1119_s23 }
 0x172   : > { %615 = vrot.lane.b32.xlu0 %v551_v25, %s1121_s13 }
 0x179   : > { %589 = vrot.lane.b32.xlu1 %v551_v25, %s1123_s16  ;;  %603 = vrot.lane.b32.xlu2 %v551_v25, %s1122_s15 }
 0x17a   : > { %605 = vrot.lane.b32.xlu0 %v552_v26, %s1122_s15 }
 0x181   : > { %579 = vrot.lane.b32.xlu1 %v552_v26, %s1124_s17  ;;  %591 = vrot.lane.b32.xlu2 %v552_v26, %s1123_s16  ;;  %s740_s16 = scalar_lea.hbm %s1534_s7, %s870_s29 }
 0x182   : > { %577 = vrot.lane.b32.xlu0 %v551_v25, %s1124_s17  ;;  %s340_s17 = scalar_lea.vmem [#allocation10], %s855_s18  ;;  %s1062_s18 = scalar_lea.hbm %s1534_s7, 16 }
 0x189   : > { %553 = vrot.lane.b32.xlu1 %v551_v25, %s1126_s4  ;;  %565 = vrot.lane.b32.xlu2 %v551_v25, %s1125_s14 }
 0x18a   : > { %567 = vrot.lane.b32.xlu0 %v552_v26, %s1125_s14  ;;  %s742_s14 = sshll.u32 %s340_s17, 4  ;;  %s743_s14 = int_to_ptr.vmem [resolvable:$true] %s742_s14 }
 0x191   : > { %555 = vrot.lane.b32.xlu2 %v552_v26, %s1126_s4  ;;  %s744_s4 = sshll.u32 %s740_s16, 4  ;;  %s745_s4 = int_to_ptr.hbm [resolvable:$true] %s744_s4 }
 0x192   : > { %673 = vperm.xlu0 %951, %v670_v45   ;;  %s1056_s12 = sshra.s32 %s745_s4, 4  ;;  %s1057_s12 = int_to_ptr.hbm [resolvable:$true] %s1056_s12 }
 0x193   : > { %s1058_s19 = scalar_lea.hbm %s1057_s12, 8  ;;  %p1063_p10 = scmp.lt.s32.totalorder %s1057_s12, %s1534_s7 }
 0x194   : > { %p1059_p1 = scmp.ne.s32.totalorder %s1057_s12, %s1058_s19  ;;  %p1064_p2 = scmp.lt.s32.totalorder %s1062_s18, %s1058_s19 }
 0x196   : > { %p1060_p4 = pnand %p1059_p1, %p1237_p5  ;;  %p1065_p11 = por %p1064_p2, %p1063_p10 }
 0x198   : > { %p1061_p9 = pneg %p1060_p4 }
 0x19a   : > { %p1066_p12 = pnand %p1065_p11, %p1061_p9 }
 0x1c3   : > { %v640_v27 = vpop.permute.xlu2 %639 }
 0x1cb   : > { %v630_v28 = vpop.permute.xlu2 %629 }
 0x1d3   : > { %v604_v39 = vpop.permute.xlu2 %603 }
 0x1db   : > { %v628_v31 = vpop.permute.xlu1 %627 }
 0x1dc   : > { %v642_v32 = vpop.permute.xlu0 %641  ;;  %v631_v33 = vsel %vm458_vm1, %v628_v31, %v630_v28  ;;  %v632_v34 = vsel %vm458_vm1, %v630_v28, %v628_v31 }
 0x1dd   : > { %v643_v35 = vsel %vm472_vm2, %v640_v27, %v642_v32  ;;  %v644_v36 = vsel %vm472_vm2, %v642_v32, %v640_v27  ;;  %v635_v42 = vmul.f32 %v631_v33, %v1339_v23  ;;  %v636_v43 = vmul.f32 %v632_v34, %v1341_v24  ;;  %v592_v24 = vpop.permute.xlu2 %591 }
 0x1de   : > { %v647_v40 = vmul.f32 %v643_v35, %v1326_v15  ;;  %v648_v41 = vmul.f32 %v644_v36, %v1328_v16 }
 0x1e0   : > { %686 = vmatpush.msra.mxu2 %v647_v40  ;;  %706 = vmatpush.msra.mxu3 %v648_v41 }
 0x1e2   : > { %687 = vmatpush.msra.mxu2 %v635_v42  ;;  %707 = vmatpush.msra.mxu3 %v636_v43 }
 0x1e3   : > { %v618_v44 = vpop.permute.xlu1 %617 }
 0x1e4   : > { %v616_v47 = vpop.permute.xlu0 %615 }
 0x1e5   : > { %v619_v15 = vsel %vm444_vm3, %v616_v47, %v618_v44  ;;  %v620_v16 = vsel %vm444_vm3, %v618_v44, %v616_v47  ;;  %v566_v58 = vpop.permute.xlu2 %565 }
 0x1e6   : > { %v623_v51 = vmul.f32 %v619_v15, %v1349_v29  ;;  %v624_v23 = vmul.f32 %v620_v16, %v1351_v30 }
 0x1e8   : > { %688 = vmatpush.msra.mxu2 %v623_v51  ;;  %708 = vmatpush.msra.mxu3 %v624_v23 }
 0x1eb   : > { %v590_v52 = vpop.permute.xlu1 %589 }
 0x1ec   : > { %v606_v53 = vpop.permute.xlu0 %605  ;;  %v593_v29 = vsel %vm414_vm5, %v590_v52, %v592_v24  ;;  %v594_v30 = vsel %vm414_vm5, %v592_v24, %v590_v52 }
 0x1ed   : > { %v607_v54 = vsel %vm430_vm4, %v604_v39, %v606_v53  ;;  %v608_v55 = vsel %vm430_vm4, %v606_v53, %v604_v39  ;;  %v597_v59 = vmul.f32 %v594_v30, %v1374_v46  ;;  %v598_v60 = vmul.f32 %v593_v29, %v1377_v48  ;;  %v556_v46 = vpop.permute.xlu2 %555 }
 0x1ee   : > { %v611_v56 = vmul.f32 %v607_v54, %v1361_v37  ;;  %v612_v57 = vmul.f32 %v608_v55, %v1363_v38 }
 0x1f0   : > { %689 = vmatpush.msra.mxu2 %v611_v56  ;;  %709 = vmatpush.msra.mxu3 %v612_v57 }
 0x1f2   : > { %690 = vmatpush.msra.mxu2 %v551_v25  ;;  %710 = vmatpush.msra.mxu3 %v552_v26 }
 0x1f3   : > { %v580_v63 = vpop.permute.xlu1 %579 }
 0x1f4   : > { %691 = vmatpush.msra.mxu2 %v597_v59  ;;  %711 = vmatpush.msra.mxu3 %v598_v60  ;;  %v578_v37 = vpop.permute.xlu0 %577 }
 0x1f5   : > { %v581_v38 = vsel %vm400_vm6, %v578_v37, %v580_v63  ;;  %v582_v0 = vsel %vm400_vm6, %v580_v63, %v578_v37 }
 0x1f6   : > { %v585_v1 = vmul.f32 %v582_v0, %v1379_v49  ;;  %v586_v2 = vmul.f32 %v581_v38, %v1381_v50 }
 0x1f8   : > { %692 = vmatpush.msra.mxu2 %v585_v1  ;;  %712 = vmatpush.msra.mxu3 %v586_v2 }
 0x1fb   : > { %v554_v4 = vpop.permute.xlu1 %553 }
 0x1fc   : > { %v568_v5 = vpop.permute.xlu0 %567  ;;  %v557_v48 = vsel %vm373_vm8, %v554_v4, %v556_v46  ;;  %v558_v6 = vsel %vm373_vm8, %v556_v46, %v554_v4 }
 0x1fd   : > { %v569_v9 = vsel %vm386_vm7, %v566_v58, %v568_v5  ;;  %v570_v49 = vsel %vm386_vm7, %v568_v5, %v566_v58  ;;  %v561_v11 = vmul.f32 %v558_v6, %v1407_v7  ;;  %v562_v12 = vmul.f32 %v557_v48, %v1409_v8 }
 0x1fe   : > { %v573_v50 = vmul.f32 %v570_v49, %v1396_v61  ;;  %v574_v10 = vmul.f32 %v569_v9, %v1398_v62 }
 0x200   : > { %693 = vmatpush.msra.mxu2 %v573_v50  ;;  %713 = vmatpush.msra.mxu3 %v574_v10 }
 0x202   : > { %694 = vmatpush.msra.mxu2 %v561_v11  ;;  %714 = vmatpush.msra.mxu3 %v562_v12 }
 0x203   : > { %862 = vmatmul.msk.f32.vlgmr.msra.gmra.mxu2 %vm507_vm9, %v651_v14  ;;  %863 = vmatmul.msk.f32.vlgmr.msra.gmra.mxu3 %vm507_vm9, %v651_v14 }
 0x204   : > { %v674_v13 = vpop.permute.xlu0 %673 }
 0x286   : > { %v696_v61 = vpop.f32.mrf.mxu2  ;;  %v716_v17 = vpop.f32.mrf.mxu3 }
 0x287   : > { %v717_v62 = vadd.f32 %v716_v17, %v674_v13  ;;  %v697_v7 = vadd.f32 %v696_v61, %v674_v13 }
 0x289   : > { %v722_v8 = vrot.slane %v717_v62, 4 }
 0x28b   : > { %v724_v18 = vsel %vm723_vm10, %v697_v7, %v722_v8 }
 0x28c   : > { %v726_v19 = vadd.f32 %v724_v18, %v1283_v3 }
 0x28e   : > { %727 = vst [vmem:[%s340_s17] sm:$0xff] %v726_v19 }
 0x28f   : > { %1069 = shalt.err (!%p1066_p12)
}
 0x290   : > { %881 = dma.vmem_to_hbm [thread:$0]  (%p1237_p5), %s743_s14, 128, %s745_s4, %s729_s28  }
 0x291 PF: > { %s756_s11 = sand.u32 1, %s1100_s24   ;;  %p1542_p13 = scmp.ge.s32.totalorder %s1112_s27, 2 }
 0x292   : > { %s757_s29 = scalar_lea.sflag [#allocation6], %s756_s11 }
 0x293   : > { %p895_p0 = pnand %p1542_p13, %p1203_p6 }
 0x295   : > { %p896_p3 = pneg %p895_p0 }
 0x297   : > { %1095 = dma.done.wait (%p896_p3), %s757_s29, 128  }
 0x298   : > { %1097 = vsyncadd (%p896_p3), %s757_s29, 4294967168  ;;  %p21_p7 = scmp.ge.s32.totalorder %s1224_s22, 4   ;;  %s1543_s24 = smov %s1104_s25 }
 0x299   : > { %s1544_s25 = smov %s1108_s26  ;;  %s1545_s26 = smov %s1233_s9 }
 0x29a   : > { %s1546_s27 = smov %s1224_s22  ;;  %23 = sbr.rel (!%p21_p7) target bundleno = 8 (0x8), region = 111 }
 0x29f   :  { %763 = vsyncpa [#allocation5], 1 }
 0x2a0   :  { %765 = vsyncpa [#allocation5 + $0x1], 1 }
 0x2a1   :  { %766 = vsyncpa [#allocation8], 1 }
 0x2a2   :  { %767 = vsyncpa [#allocation6], 1 }
 0x2a3   :  { %769 = vsyncpa [#allocation6 + $0x1], 1 }

</bundles_post_ra>
